<compile_context>
chip_gen: v5e
topology: v5e:2x2
jax: 0.10.0
libtpu: 0.0.40
codegen_flags: <defaults>
</compile_context>

<pallas_src>
import jax
import jax.numpy as jnp
from jax.experimental import pallas as pl
from jax.experimental.pallas import tpu as pltpu  # noqa: F401  (TPU backend)


def fused_conv1x1_chain_kernel(x_ref, w_ref, b_ref, o_ref):
    # x_ref: (1, L)   padded input, flattened spatially, f32
    # w_ref: (C, 1)   folded per-channel weight  4*(w1 + w2)
    # b_ref: (C, 1)   folded per-channel bias    4*(b1 + b2)
    # o_ref: (C, L)   lane-dense output
    x = x_ref[...]                                   # (1, L)
    w = w_ref[...]                                   # (C, 1)
    b = b_ref[...]                                   # (C, 1)
    # Whole graph collapses to a single FMA + relu per element.
    o_ref[...] = jnp.maximum(x * w + b, 0.0)


def fold_params(w1, b1, w2, b2):
    """One-time parameter fold: the entire add/relu chain equals relu(x*4(w1+w2)+4(b1+b2))."""
    cout = w1.shape[0]
    wk = (4.0 * (w1 + w2)).reshape(cout, 1).astype(jnp.float32)
    bk = (4.0 * (b1 + b2)).reshape(cout, 1).astype(jnp.float32)
    return wk, bk


def model_forward(x1, wk, bk):
    """x1: (1, 1, H, W) f32.  wk/bk: (8, 1) folded params.  Returns (1, 8, H+2, W+2)."""
    n, cin, h, w = x1.shape
    assert n == 1 and cin == 1
    cout = wk.shape[0]
    hp, wp = h + 2, w + 2                            # padding=1, kernel=1, stride=1
    length = hp * wp

    # Wrapper-side glue: pad + flatten the spatial slab (lane-dense kernel input).
    x_flat = jnp.pad(x1[0, 0], ((1, 1), (1, 1))).reshape(1, length)

    out_flat = pl.pallas_call(
        fused_conv1x1_chain_kernel,
        out_shape=jax.ShapeDtypeStruct((cout, length), jnp.float32),
        in_specs=[
            pl.BlockSpec((1, length), lambda: (0, 0)),
            pl.BlockSpec((cout, 1), lambda: (0, 0)),
            pl.BlockSpec((cout, 1), lambda: (0, 0)),
        ],
        out_specs=pl.BlockSpec((cout, length), lambda: (0, 0)),
    )(x_flat, wk, bk)

    # Free, contiguous reshape back to the PyTorch NCHW output layout.
    return out_flat.reshape(1, cout, hp, wp)


def _reference(x1, w1, b1, w2, b2):
    """Pure-JAX reference of the ORIGINAL (unfused) graph, for a sanity check."""
    x_pad = jnp.pad(x1[0, 0], ((1, 1), (1, 1)))[None, :, :]
    v1 = x_pad * w1.reshape(-1, 1, 1) + b1.reshape(-1, 1, 1)
    v2 = x_pad * w2.reshape(-1, 1, 1) + b2.reshape(-1, 1, 1)
    v4 = jnp.maximum(v1 + v2, 0.0)
    v7 = jnp.maximum(v2 + (v1 + v4), 0.0)
    v11 = jnp.maximum(v2 + (v1 + v7), 0.0)
    v15 = jnp.maximum(v2 + (v1 + v11), 0.0)
    return v15[None]


if __name__ == "__main__":
    key = jax.random.PRNGKey(0)
    kx, kw1, kb1, kw2, kb2 = jax.random.split(key, 5)

    # Input matching the module: (N=1, C=1, H=64, W=64)
    x1 = jax.random.normal(kx, (1, 1, 64, 64), dtype=jnp.float32)

    # Deterministic parameter init (Conv2d(1, 8, 1): weight (8,1,1,1), bias (8,))
    w1 = jax.random.normal(kw1, (8, 1, 1, 1), dtype=jnp.float32) * 0.5
    b1 = jax.random.normal(kb1, (8,), dtype=jnp.float32) * 0.1
    w2 = jax.random.normal(kw2, (8, 1, 1, 1), dtype=jnp.float32) * 0.5
    b2 = jax.random.normal(kb2, (8,), dtype=jnp.float32) * 0.1

    # Parameter fold hoisted out of the per-call path (weights are static).
    wk, bk = fold_params(w1, b1, w2, b2)
    wk, bk = jax.block_until_ready((wk, bk))

    fwd = jax.jit(model_forward)
    out = fwd(x1, wk, bk)
    out = jax.block_until_ready(out)

    ref = _reference(x1, w1, b1, w2, b2)
    assert out.shape == (1, 8, 66, 66), out.shape
    assert jnp.allclose(out, ref, atol=1e-5, rtol=1e-5)

    print("KERNEL_OK")
</pallas_src>

<mosaic_0001>
module attributes {stable_mosaic.version = 11 : i64} {
  func.func @fused_conv1x1_chain_kernel(%arg0: memref<1x4356xf32, #tpu.memory_space<vmem>>, %arg1: memref<8x1xf32, #tpu.memory_space<vmem>>, %arg2: memref<8x1xf32, #tpu.memory_space<vmem>>, %arg3: memref<8x4356xf32, #tpu.memory_space<vmem>>) attributes {dimension_semantics = [], scalar_prefetch = 0 : i64, scratch_operands = 0 : i64, tpu.core_type = #tpu.core_type<tc>} {
    %c0 = arith.constant 0 : index
    %c0_0 = arith.constant 0 : index
    %0 = vector.load %arg0[%c0, %c0_0] : memref<1x4356xf32, #tpu.memory_space<vmem>>, vector<1x4356xf32>
    %c0_1 = arith.constant 0 : index
    %c0_2 = arith.constant 0 : index
    %1 = vector.load %arg1[%c0_1, %c0_2] : memref<8x1xf32, #tpu.memory_space<vmem>>, vector<8x1xf32>
    %c0_3 = arith.constant 0 : index
    %c0_4 = arith.constant 0 : index
    %2 = vector.load %arg2[%c0_3, %c0_4] : memref<8x1xf32, #tpu.memory_space<vmem>>, vector<8x1xf32>
    %3 = vector.broadcast %0 : vector<1x4356xf32> to vector<8x4356xf32>
    %4 = vector.broadcast %1 : vector<8x1xf32> to vector<8x4356xf32>
    %5 = arith.mulf %3, %4 : vector<8x4356xf32>
    %6 = vector.broadcast %2 : vector<8x1xf32> to vector<8x4356xf32>
    %7 = arith.addf %5, %6 : vector<8x4356xf32>
    %cst = arith.constant 0.000000e+00 : f32
    %8 = vector.broadcast %cst : f32 to vector<8x4356xf32>
    %9 = arith.maximumf %7, %8 : vector<8x4356xf32>
    %c0_5 = arith.constant 0 : index
    %c0_6 = arith.constant 0 : index
    %10 = vector.load %arg3[%c0_5, %c0_6] : memref<8x4356xf32, #tpu.memory_space<vmem>>, vector<8x4356xf32>
    tpu.vector_store %arg3[%c0_5, %c0_6], %9 {strides = array<i32>} : memref<8x4356xf32, #tpu.memory_space<vmem>>, vector<8x4356xf32>,
    return
  }
}

</mosaic_0001>

<bundles_post_ra>
// kernel: model_forward.1
= control target key start
LH: loop header
LB: loop body
LE: loop exit
PB: predicated region body
PF: predicated region fallthrough
CT: control target
= control target key end

     0   :  { %v253_v0 = vmov 0   ;;  %vm245_vm0 = vcmask 31744   ;;  %s494_s1 = inlined_call_operand.vmem [shape: f32[8,1], index: 1, kind: input, shape index: {}]   ;;  %s495_s2 = inlined_call_operand.vmem [shape: f32[8,1], index: 2, kind: input, shape index: {}]   ;;  %s496_s0 = inlined_call_operand.vmem [shape: f32[1,4356], index: 0, kind: input, shape index: {}]   ;;  %s497_s3 = inlined_call_operand.vmem [shape: f32[8,4356], index: 3, kind: output, shape index: {}]  }
   0x1   :  { %252 = vset.pattern.permute.xlu0 %v253_v0  ;;  %v19_v1 = vld [vmem:[%s494_s1] sm:$0xff]  ;;  %v15_v11 = vld [vmem:[%s496_s0 + $0x8] sm:$0xff]  ;;  %v309_v39 = vld [vmem:[%s496_s0 + $0x10] sm:$0xff] }
   0x2   :  { %98 = vperm.xlu0 %252, %v19_v1   ;;  %v20_v2 = vld [vmem:[%s495_s2] sm:$0xff]  ;;  %v34_v19 = vperm.slane %v15_v11, 0  ;;  %v35_v23 = vperm.slane %v15_v11, 1  ;;  %v36_v27 = vperm.slane %v15_v11, 2  ;;  %v37_v28 = vperm.slane %v15_v11, 3 }
   0x3   :  { %v14_v4 = vld [vmem:[%s496_s0] sm:$0xff]  ;;  %v38_v31 = vperm.slane %v15_v11, 4  ;;  %v39_v32 = vperm.slane %v15_v11, 5  ;;  %v40_v44 = vperm.slane %v15_v11, 6  ;;  %v41_v48 = vperm.slane %v15_v11, 7 }
   0x4   :  { %v26_v5 = vperm.slane %v14_v4, 0  ;;  %v27_v6 = vperm.slane %v14_v4, 1  ;;  %v28_v7 = vperm.slane %v14_v4, 2  ;;  %v29_v8 = vperm.slane %v14_v4, 3 }
   0x5   :  { %v30_v9 = vperm.slane %v14_v4, 4  ;;  %v31_v12 = vperm.slane %v14_v4, 5  ;;  %v32_v13 = vperm.slane %v14_v4, 6  ;;  %v33_v16 = vperm.slane %v14_v4, 7 }
   0x6   :  { %v42_v52 = vperm.slane %v309_v39, 0  ;;  %v43_v56 = vperm.slane %v309_v39, 1  ;;  %v44_v60 = vperm.slane %v309_v39, 2  ;;  %v45_v0 = vperm.slane %v309_v39, 3 }
   0x7   :  { %v47_v11 = vperm.slane %v309_v39, 5 }
   0xa   :  { %138 = vperm.xlu0 %252, %v20_v2  }
  0x74   :  { %v280_v3 = vpop.permute.xlu0 %98 }
  0x75   :  { %v101_v14 = vmul.f32 %v280_v3, %v26_v5  ;;  %v102_v15 = vmul.f32 %v280_v3, %v27_v6  ;;  %v103_v17 = vmul.f32 %v280_v3, %v28_v7  ;;  %v104_v18 = vmul.f32 %v280_v3, %v29_v8 }
  0x76   :  { %v105_v20 = vmul.f32 %v280_v3, %v30_v9  ;;  %v106_v24 = vmul.f32 %v280_v3, %v31_v12  ;;  %v107_v29 = vmul.f32 %v280_v3, %v32_v13  ;;  %v108_v33 = vmul.f32 %v280_v3, %v33_v16  ;;  %v356_v9 = vld [vmem:[%s496_s0 + $0x18] sm:$0xff] }
  0x77   :  { %v109_v35 = vmul.f32 %v280_v3, %v34_v19  ;;  %v110_v40 = vmul.f32 %v280_v3, %v35_v23  ;;  %v111_v45 = vmul.f32 %v280_v3, %v36_v27  ;;  %v112_v49 = vmul.f32 %v280_v3, %v37_v28 }
  0x78   :  { %v113_v53 = vmul.f32 %v280_v3, %v38_v31  ;;  %v114_v57 = vmul.f32 %v280_v3, %v39_v32  ;;  %v115_v61 = vmul.f32 %v280_v3, %v40_v44  ;;  %v116_v1 = vmul.f32 %v280_v3, %v41_v48 }
  0x79   :  { %v46_v5 = vperm.slane %v309_v39, 4  ;;  %v117_v6 = vmul.f32 %v280_v3, %v42_v52  ;;  %v118_v12 = vmul.f32 %v280_v3, %v43_v56  ;;  %v119_v16 = vmul.f32 %v280_v3, %v44_v60 }
  0x7a   :  { %v49_v19 = vperm.slane %v309_v39, 7  ;;  %v50_v23 = vperm.slane %v356_v9, 0  ;;  %v51_v27 = vperm.slane %v356_v9, 1  ;;  %v122_v28 = vmul.f32 %v280_v3, %v47_v11 }
  0x7b   :  { %v52_v31 = vperm.slane %v356_v9, 2  ;;  %v55_v44 = vperm.slane %v356_v9, 5  ;;  %v56_v48 = vperm.slane %v356_v9, 6  ;;  %v57_v52 = vperm.slane %v356_v9, 7 }
  0x7c   :  { %v285_v10 = vpop.permute.xlu0 %138 }
  0x7d   :  { %v141_v21 = vadd.f32 %v285_v10, %v101_v14  ;;  %v142_v22 = vadd.f32 %v285_v10, %v102_v15  ;;  %v143_v25 = vadd.f32 %v285_v10, %v103_v17  ;;  %v144_v26 = vadd.f32 %v285_v10, %v104_v18 }
  0x7e   :  { %v145_v30 = vadd.f32 %v285_v10, %v105_v20  ;;  %v146_v34 = vadd.f32 %v285_v10, %v106_v24  ;;  %v147_v36 = vadd.f32 %v285_v10, %v107_v29  ;;  %v148_v41 = vadd.f32 %v285_v10, %v108_v33 }
  0x7f   :  { %v176_v37 = vmax.f32 %v141_v21, 0.0  ;;  %v177_v38 = vmax.f32 %v142_v22, 0.0  ;;  %v178_v42 = vmax.f32 %v143_v25, 0.0  ;;  %v179_v43 = vmax.f32 %v144_v26, 0.0 }
  0x80   :  { %v149_v46 = vadd.f32 %v285_v10, %v109_v35  ;;  %v180_v47 = vmax.f32 %v145_v30, 0.0  ;;  %v150_v50 = vadd.f32 %v285_v10, %v110_v40  ;;  %v181_v51 = vmax.f32 %v146_v34, 0.0 }
  0x81   :  { %211 = vst [vmem:[%s497_s3] sm:$0xff] %v176_v37  ;;  %v151_v54 = vadd.f32 %v285_v10, %v111_v45  ;;  %v182_v55 = vmax.f32 %v147_v36, 0.0  ;;  %v152_v58 = vadd.f32 %v285_v10, %v112_v49  ;;  %v183_v59 = vmax.f32 %v148_v41, 0.0 }
  0x82   :  { %212 = vst [vmem:[%s497_s3 + $0x8] sm:$0xff] %v177_v38  ;;  %v153_v62 = vadd.f32 %v285_v10, %v113_v53  ;;  %v184_v63 = vmax.f32 %v149_v46, 0.0  ;;  %v154_v2 = vadd.f32 %v285_v10, %v114_v57  ;;  %v185_v4 = vmax.f32 %v150_v50, 0.0 }
  0x83   :  { %213 = vst [vmem:[%s497_s3 + $0x10] sm:$0xff] %v178_v42  ;;  %v155_v7 = vadd.f32 %v285_v10, %v115_v61  ;;  %v186_v8 = vmax.f32 %v151_v54, 0.0  ;;  %v156_v13 = vadd.f32 %v285_v10, %v116_v1  ;;  %v187_v14 = vmax.f32 %v152_v58, 0.0 }
  0x84   :  { %214 = vst [vmem:[%s497_s3 + $0x18] sm:$0xff] %v179_v43  ;;  %v48_v15 = vperm.slane %v309_v39, 6  ;;  %v157_v17 = vadd.f32 %v285_v10, %v117_v6  ;;  %v188_v18 = vmax.f32 %v153_v62, 0.0  ;;  %v120_v20 = vmul.f32 %v280_v3, %v45_v0  ;;  %v18_v43 = vld [vmem:[%s496_s0 + $0x20] sm:$0x7] }
  0x85   :  { %215 = vst [vmem:[%s497_s3 + $0x20] sm:$0xff] %v180_v47  ;;  %v158_v21 = vadd.f32 %v285_v10, %v118_v12  ;;  %v189_v22 = vmax.f32 %v154_v2, 0.0  ;;  %v121_v24 = vmul.f32 %v280_v3, %v46_v5  ;;  %v159_v25 = vadd.f32 %v285_v10, %v119_v16 }
  0x86   :  { %216 = vst [vmem:[%s497_s3 + $0x28] sm:$0xff] %v181_v51  ;;  %v190_v26 = vmax.f32 %v155_v7, 0.0  ;;  %v160_v29 = vadd.f32 %v285_v10, %v120_v20  ;;  %v191_v30 = vmax.f32 %v156_v13, 0.0  ;;  %v123_v32 = vmul.f32 %v280_v3, %v48_v15 }
  0x87   :  { %217 = vst [vmem:[%s497_s3 + $0x30] sm:$0xff] %v182_v55  ;;  %v161_v33 = vadd.f32 %v285_v10, %v121_v24  ;;  %v192_v34 = vmax.f32 %v157_v17, 0.0  ;;  %v53_v35 = vperm.slane %v356_v9, 3  ;;  %v124_v36 = vmul.f32 %v280_v3, %v49_v19 }
  0x88   :  { %218 = vst [vmem:[%s497_s3 + $0x38] sm:$0xff] %v183_v59  ;;  %v162_v37 = vadd.f32 %v285_v10, %v122_v28  ;;  %v193_v38 = vmax.f32 %v158_v21, 0.0  ;;  %v54_v39 = vperm.slane %v356_v9, 4  ;;  %v125_v40 = vmul.f32 %v280_v3, %v50_v23 }
  0x89   :  { %219 = vst [vmem:[%s497_s3 + $0x40] sm:$0xff] %v184_v63  ;;  %v163_v41 = vadd.f32 %v285_v10, %v123_v32  ;;  %v194_v42 = vmax.f32 %v159_v25, 0.0  ;;  %v126_v45 = vmul.f32 %v280_v3, %v51_v27  ;;  %v164_v46 = vadd.f32 %v285_v10, %v124_v36 }
  0x8a   :  { %220 = vst [vmem:[%s497_s3 + $0x48] sm:$0xff] %v185_v4  ;;  %v195_v47 = vmax.f32 %v160_v29, 0.0  ;;  %v127_v49 = vmul.f32 %v280_v3, %v52_v31  ;;  %v165_v50 = vadd.f32 %v285_v10, %v125_v40  ;;  %v196_v51 = vmax.f32 %v161_v33, 0.0 }
  0x8b   :  { %221 = vst [vmem:[%s497_s3 + $0x50] sm:$0xff] %v186_v8  ;;  %v128_v53 = vmul.f32 %v280_v3, %v53_v35  ;;  %v166_v54 = vadd.f32 %v285_v10, %v126_v45  ;;  %v197_v55 = vmax.f32 %v162_v37, 0.0  ;;  %v58_v56 = vperm.slane %v18_v43, 0 }
  0x8c   :  { %222 = vst [vmem:[%s497_s3 + $0x58] sm:$0xff] %v187_v14  ;;  %v129_v57 = vmul.f32 %v280_v3, %v54_v39  ;;  %v167_v58 = vadd.f32 %v285_v10, %v127_v49  ;;  %v198_v59 = vmax.f32 %v163_v41, 0.0  ;;  %v59_v60 = vperm.slane %v18_v43, 1 }
  0x8d   :  { %223 = vst [vmem:[%s497_s3 + $0x60] sm:$0xff] %v188_v18  ;;  %v130_v61 = vmul.f32 %v280_v3, %v55_v44  ;;  %v168_v62 = vadd.f32 %v285_v10, %v128_v53  ;;  %v199_v63 = vmax.f32 %v164_v46, 0.0  ;;  %v60_v0 = vperm.slane %v18_v43, 2 }
  0x8e   :  { %224 = vst [vmem:[%s497_s3 + $0x68] sm:$0xff] %v189_v22  ;;  %v131_v1 = vmul.f32 %v280_v3, %v56_v48  ;;  %v169_v2 = vadd.f32 %v285_v10, %v129_v57  ;;  %v200_v4 = vmax.f32 %v165_v50, 0.0  ;;  %v132_v5 = vmul.f32 %v280_v3, %v57_v52 }
  0x8f   :  { %225 = vst [vmem:[%s497_s3 + $0x70] sm:$0xff] %v190_v26  ;;  %v170_v6 = vadd.f32 %v285_v10, %v130_v61  ;;  %v201_v7 = vmax.f32 %v166_v54, 0.0  ;;  %v133_v8 = vmul.f32 %v280_v3, %v58_v56  ;;  %v202_v11 = vmax.f32 %v167_v58, 0.0 }
  0x90   :  { %226 = vst [vmem:[%s497_s3 + $0x78] sm:$0xff] %v191_v30  ;;  %v171_v9 = vadd.f32 %v285_v10, %v131_v1  ;;  %v134_v12 = vmul.f32 %v280_v3, %v59_v60  ;;  %v172_v13 = vadd.f32 %v285_v10, %v132_v5  ;;  %v203_v14 = vmax.f32 %v168_v62, 0.0 }
  0x91   :  { %227 = vst [vmem:[%s497_s3 + $0x80] sm:$0xff] %v192_v34  ;;  %v135_v15 = vmul.f32 %v280_v3, %v60_v0  ;;  %v173_v16 = vadd.f32 %v285_v10, %v133_v8  ;;  %v204_v17 = vmax.f32 %v169_v2, 0.0  ;;  %v205_v19 = vmax.f32 %v170_v6, 0.0 }
  0x92   :  { %228 = vst [vmem:[%s497_s3 + $0x88] sm:$0xff] %v193_v38  ;;  %v174_v18 = vadd.f32 %v285_v10, %v134_v12  ;;  %v206_v21 = vmax.f32 %v171_v9, 0.0  ;;  %v207_v3 = vmax.f32 %v172_v13, 0.0 }
  0x93   :  { %229 = vst [vmem:[%s497_s3 + $0x90] sm:$0xff] %v194_v42  ;;  %v175_v20 = vadd.f32 %v285_v10, %v135_v15  ;;  %v208_v22 = vmax.f32 %v173_v16, 0.0 }
  0x94   :  { %230 = vst [vmem:[%s497_s3 + $0x98] sm:$0xff] %v195_v47  ;;  %v209_v23 = vmax.f32 %v174_v18, 0.0 }
  0x95   :  { %231 = vst [vmem:[%s497_s3 + $0xa0] sm:$0xff] %v196_v51  ;;  %v210_v10 = vmax.f32 %v175_v20, 0.0 }
  0x96   :  { %232 = vst [vmem:[%s497_s3 + $0xa8] sm:$0xff] %v197_v55 }
  0x97   :  { %233 = vst [vmem:[%s497_s3 + $0xb0] sm:$0xff] %v198_v59 }
  0x98   :  { %234 = vst [vmem:[%s497_s3 + $0xb8] sm:$0xff] %v199_v63 }
  0x99   :  { %235 = vst [vmem:[%s497_s3 + $0xc0] sm:$0xff] %v200_v4 }
  0x9a   :  { %236 = vst [vmem:[%s497_s3 + $0xc8] sm:$0xff] %v201_v7 }
  0x9b   :  { %237 = vst [vmem:[%s497_s3 + $0xd0] sm:$0xff] %v202_v11 }
  0x9c   :  { %238 = vst [vmem:[%s497_s3 + $0xd8] sm:$0xff] %v203_v14 }
  0x9d   :  { %239 = vst [vmem:[%s497_s3 + $0xe0] sm:$0xff] %v204_v17 }
  0x9e   :  { %240 = vst [vmem:[%s497_s3 + $0xe8] sm:$0xff] %v205_v19 }
  0x9f   :  { %241 = vst [vmem:[%s497_s3 + $0xf0] sm:$0xff] %v206_v21 }
  0xa0   :  { %242 = vst [vmem:[%s497_s3 + $0xf8] sm:$0xff] %v207_v3 }
  0xa1   :  { %243 = vst [vmem:[%s497_s3 + $0x100] sm:$0xff] %v208_v22 }
  0xa2   :  { %244 = vst [vmem:[%s497_s3 + $0x108] sm:$0xff] %v209_v23 }
  0xa3   :  { %246 = vst.msk [vmem:[%s497_s3 + $0x110] sm:$0xff] %vm245_vm0, %v210_v10 }

</bundles_post_ra>
